<compile_context>
chip_gen: v6e
topology: v6e:2x2x1
jax: 0.10.0
libtpu: 0.0.40
codegen_flags: <defaults>
</compile_context>

<pallas_src>
import math
import functools

import jax
import jax.numpy as jnp
from jax import lax
from jax.experimental import pallas as pl
from jax.experimental.pallas import tpu as pltpu

_MIB = 1024 * 1024


def _cdiv(a, b):
    return (a + b - 1) // b


def _round_up(a, b):
    return _cdiv(a, b) * b


@functools.lru_cache(maxsize=None)
def _vmem_capacity_bytes():
    """Per-core VMEM capacity; conservative 64 MiB (v7x) if the query fails."""
    try:
        cap = int(pltpu.get_tpu_info().vmem_capacity_bytes)
        if cap > 0:
            return cap
    except Exception:  # hardware-info query only; never masks kernel errors
        pass
    return 64 * _MIB


@functools.lru_cache(maxsize=None)
def _has_single_buffered_blockspec():
    """Feature probe: BlockSpec(pipeline_mode=pl.Buffered(1)) works end-to-end.

    Probed on a tiny standalone copy kernel so genuine errors in the real MLP
    kernel are never masked by this check.
    """
    if not hasattr(pl, "Buffered"):
        return False
    try:
        spec = pl.BlockSpec((8, 128), lambda i: (0, 0),
                            pipeline_mode=pl.Buffered(1))
    except TypeError:
        return False
    try:
        def _copy(x_ref, o_ref):
            o_ref[...] = x_ref[...]

        y = pl.pallas_call(
            _copy,
            out_shape=jax.ShapeDtypeStruct((8, 128), jnp.float32),
            grid_spec=pltpu.PrefetchScalarGridSpec(
                num_scalar_prefetch=0, grid=(1,),
                in_specs=[spec],
                out_specs=pl.BlockSpec((8, 128), lambda i: (0, 0))),
        )(jnp.zeros((8, 128), jnp.float32))
        jax.block_until_ready(y)
        return True
    except Exception:  # isolated probe only
        return False


def _gelu_f32(h, exact):
    if exact:  # nn.GELU() default (erf-based), computed in f32 on the VPU
        return 0.5 * h * (1.0 + lax.erf(h * jnp.float32(0.7071067811865476)))
    # tanh approximation -> EUP slot (frees VALU); slight deviation from exact.
    c = jnp.float32(0.7978845608028654)  # sqrt(2/pi)
    return 0.5 * h * (1.0 + jnp.tanh(c * (h + jnp.float32(0.044715) * h * h * h)))


# ---------------------------------------------------------------------------
# Kernels
# ---------------------------------------------------------------------------
def _mlp_resident_kernel(x_ref, w1_ref, b1_ref, w2_ref, b2_ref, o_ref, *,
                         kc, n_chunks, gelu_exact):
    # x_ref : (tm, D)  compute dtype       w1_ref: (D, D)  (in, hidden) layout
    # b1_ref: (1, D)   f32                 w2_ref: (D, D)  (hidden, out) layout
    # b2_ref: (1, D)   f32                 o_ref : (tm, D) output dtype
    x = x_ref[...]
    acc = jnp.zeros((x.shape[0], w2_ref.shape[1]), jnp.float32)
    # Hidden dim chunked with static offsets (fully unrolled): bias + erf-GELU
    # + bf16 cast of chunk k overlaps with matmul2 of chunk k-1, and the f32
    # intermediate is only (tm, kc).
    for k in range(n_chunks):
        off = k * kc
        h = jnp.dot(x, w1_ref[:, off:off + kc],
                    preferred_element_type=jnp.float32)
        h = h + b1_ref[:, off:off + kc]
        h = _gelu_f32(h, gelu_exact).astype(w2_ref.dtype)
        acc = acc + jnp.dot(h, w2_ref[off:off + kc, :],
                            preferred_element_type=jnp.float32)
    o_ref[...] = (acc + b2_ref[...]).astype(o_ref.dtype)


def _mlp_stream_kernel(x_ref, w1_ref, b1_ref, w2_ref, b2_ref, o_ref, acc_ref,
                       *, gelu_exact):
    # Grid axis 1 streams the hidden dim: w1_ref (D, tk), w2_ref (tk, D).
    k = pl.program_id(1)

    @pl.when(k == 0)
    def _():
        acc_ref[...] = jnp.zeros_like(acc_ref)

    h = jnp.dot(x_ref[...], w1_ref[...], preferred_element_type=jnp.float32)
    h = h + b1_ref[...]
    h = _gelu_f32(h, gelu_exact).astype(w2_ref.dtype)
    acc_ref[...] += jnp.dot(h, w2_ref[...], preferred_element_type=jnp.float32)

    @pl.when(k == pl.num_programs(1) - 1)
    def _():
        o_ref[...] = (acc_ref[...] + b2_ref[...]).astype(o_ref.dtype)


# ---------------------------------------------------------------------------
# Wrapper
# ---------------------------------------------------------------------------
def _pick_divisor_tile(D, candidates):
    for t in candidates:
        if D % t == 0:
            return t
    return D


def _pick_tm(N, sub, fixed_bytes, per_row_bytes, usable, tm_req):
    if tm_req is not None:
        desired = max(sub, _round_up(tm_req, sub))
    else:
        desired = 256
        for cand in (1024, 512, 384, 256):
            if fixed_bytes + cand * per_row_bytes <= int(0.85 * usable):
                desired = cand
                break
        # Keep both TensorCores busy (megacore) when splitting costs nothing.
        if N >= 512 and desired >= N:
            desired = _round_up(_cdiv(N, 2), sub)
    if N <= sub:
        return N                       # single block; block dims == array dims
    return max(sub, min(desired, (N // sub) * sub))


@functools.partial(
    jax.jit,
    static_argnames=("compute_dtype", "tm", "gelu_exact", "force_stream",
                     "single_buffer", "vmem_cap"))
def _mlp_impl(x, w1, b1, w2, b2, *, compute_dtype, tm, gelu_exact,
              force_stream, single_buffer, vmem_cap):
    orig_shape = x.shape
    out_dtype = x.dtype
    D = orig_shape[-1]
    x2 = x.reshape(-1, D).astype(compute_dtype)
    N = x2.shape[0]

    cbytes = jnp.dtype(compute_dtype).itemsize
    obytes = jnp.dtype(out_dtype).itemsize
    sub = 16 if cbytes == 2 else 8

    # One-time layout change under jit: MXU-native (K, N) weights.
    w1t = w1.T.astype(compute_dtype)             # (in, hidden)
    w2t = w2.T.astype(compute_dtype)             # (hidden, out)
    b1r = b1.reshape(1, D).astype(jnp.float32)
    b2r = b2.reshape(1, D).astype(jnp.float32)

    usable = max(32 * _MIB, vmem_cap - 8 * _MIB)  # headroom for Mosaic scratch

    wt_bufs = 1 if single_buffer else 2
    resident_w_bytes = wt_bufs * 2 * D * D * cbytes
    use_stream = force_stream or (resident_w_bytes > int(0.55 * usable))

    if not use_stream:
        # ------------------- resident-weight path -------------------
        kc = _pick_divisor_tile(D, (512, 256, 128))
        per_row = D * (2 * cbytes + 2 * obytes + 4) + kc * (4 + cbytes)
        fixed = resident_w_bytes + wt_bufs * 2 * 8 * D * 4
        tm_eff = _pick_tm(N, sub, fixed, per_row, usable, tm)
        grid = (_cdiv(N, tm_eff),)

        need = (fixed
                + tm_eff * D * (2 * cbytes + 2 * obytes + 4)
                + tm_eff * kc * (4 + cbytes))
        vmem_limit = int(min(usable, max(32 * _MIB, int(need * 1.4))))

        resident_kwargs = (
            {"pipeline_mode": pl.Buffered(1)} if single_buffer else {})
        w_spec = pl.BlockSpec((D, D), lambda i: (0, 0), **resident_kwargs)
        b_spec = pl.BlockSpec((1, D), lambda i: (0, 0), **resident_kwargs)

        kernel = functools.partial(
            _mlp_resident_kernel, kc=kc, n_chunks=D // kc,
            gelu_exact=gelu_exact)

        cost = pl.CostEstimate(
            flops=4 * N * D * D,
            transcendentals=N * D,
            bytes_accessed=N * D * (cbytes + obytes) + 2 * D * D * cbytes + 8 * D)

        out = pl.pallas_call(
            kernel,
            out_shape=jax.ShapeDtypeStruct((N, D), out_dtype),
            grid_spec=pltpu.PrefetchScalarGridSpec(
                num_scalar_prefetch=0,
                grid=grid,
                in_specs=[
                    pl.BlockSpec((tm_eff, D), lambda i: (i, 0)),  # x row tile
                    w_spec,                                       # W1^T resident
                    b_spec,                                       # b1
                    w_spec,                                       # W2^T resident
                    b_spec,                                       # b2
                ],
                out_specs=pl.BlockSpec((tm_eff, D), lambda i: (i, 0)),
            ),
            compiler_params=pltpu.CompilerParams(
                dimension_semantics=("parallel",),
                vmem_limit_bytes=vmem_limit,
            ),
            cost_estimate=cost,
        )(x2, w1t, b1r, w2t, b2r)
    else:
        # ------------------- hidden-dim streaming path -------------------
        tk = _pick_divisor_tile(D, (512, 256, 128))
        # TODO(synk): if D is not a multiple of 128 the hidden dim cannot be
        # tiled safely (masked weight columns would contaminate the output),
        # so tk falls back to D (weights re-streamed whole per row tile).
        per_row = D * (2 * cbytes + 2 * obytes + 4) + tk * (4 + cbytes)
        fixed = 4 * D * tk * cbytes + 4 * 8 * max(tk, D) * 4
        tm_eff = _pick_tm(N, sub, fixed, per_row, usable, tm)
        grid = (_cdiv(N, tm_eff), D // tk)

        need = fixed + tm_eff * per_row
        vmem_limit = int(min(usable, max(32 * _MIB, int(need * 1.4))))

        kernel = functools.partial(_mlp_stream_kernel, gelu_exact=gelu_exact)

        cost = pl.CostEstimate(
            flops=4 * N * D * D,
            transcendentals=N * D,
            bytes_accessed=(N * D * (cbytes + obytes)
                            + grid[0] * 2 * D * D * cbytes + 8 * D))

        out = pl.pallas_call(
            kernel,
            out_shape=jax.ShapeDtypeStruct((N, D), out_dtype),
            grid_spec=pltpu.PrefetchScalarGridSpec(
                num_scalar_prefetch=0,
                grid=grid,
                in_specs=[
                    pl.BlockSpec((tm_eff, D), lambda i, k: (i, 0)),  # x (k-resident)
                    pl.BlockSpec((D, tk), lambda i, k: (0, k)),      # W1^T cols
                    pl.BlockSpec((1, tk), lambda i, k: (0, k)),      # b1 tile
                    pl.BlockSpec((tk, D), lambda i, k: (k, 0)),      # W2^T rows
                    pl.BlockSpec((1, D), lambda i, k: (0, 0)),       # b2
                ],
                out_specs=pl.BlockSpec((tm_eff, D), lambda i, k: (i, 0)),
                scratch_shapes=[pltpu.VMEM((tm_eff, D), jnp.float32)],
            ),
            compiler_params=pltpu.CompilerParams(
                dimension_semantics=("parallel", "arbitrary"),
                vmem_limit_bytes=vmem_limit,
            ),
            cost_estimate=cost,
        )(x2, w1t, b1r, w2t, b2r)

    return out.reshape(orig_shape)


def mlp_pallas(x, w1, b1, w2, b2, *, compute_dtype=jnp.bfloat16, tm=None,
               gelu_exact=True, force_stream=False):
    """out = l2(GELU(l1(x))).  x: (..., D); w1, w2: (D, D) PyTorch (out, in); b: (D,)."""
    return _mlp_impl(
        x, w1, b1, w2, b2,
        compute_dtype=compute_dtype, tm=tm, gelu_exact=gelu_exact,
        force_stream=force_stream,
        single_buffer=_has_single_buffered_blockspec(),
        vmem_cap=_vmem_capacity_bytes())


# ---------------------------------------------------------------------------
# Reference + self-test
# ---------------------------------------------------------------------------
def _init_linear_params(key, dim):
    # nn.Linear default init: U(-1/sqrt(fan_in), 1/sqrt(fan_in))
    kw, kb = jax.random.split(key)
    bound = 1.0 / math.sqrt(dim)
    w = jax.random.uniform(kw, (dim, dim), jnp.float32, -bound, bound)
    b = jax.random.uniform(kb, (dim,), jnp.float32, -bound, bound)
    return w, b


def _mlp_ref(x, w1, b1, w2, b2):
    h = x @ w1.T + b1
    h = 0.5 * h * (1.0 + lax.erf(h / jnp.sqrt(2.0)))
    return h @ w2.T + b2


if __name__ == "__main__":
    key = jax.random.PRNGKey(0)
    k_x, k_l1, k_l2, k_x2, k_l1b, k_l2b = jax.random.split(key, 6)

    # --- small shapes consistent with the module: batch=2, seq=8, hidden=32 ---
    B, S, D = 2, 8, 32
    x = jax.random.normal(k_x, (B, S, D), jnp.float32)
    w1, b1 = _init_linear_params(k_l1, D)
    w2, b2 = _init_linear_params(k_l2, D)
    ref = _mlp_ref(x, w1, b1, w2, b2)

    # Exact-precision path (f32 MXU inputs): validates erf-GELU / linear semantics.
    out_f32 = jax.block_until_ready(
        mlp_pallas(x, w1, b1, w2, b2, compute_dtype=jnp.float32))
    assert out_f32.shape == (B, S, D)
    assert jnp.allclose(out_f32, ref, atol=1e-5, rtol=1e-5), "f32 path mismatch"

    # Performance path (bf16 MXU inputs, f32 accumulation + f32 GELU/bias).
    out_bf16 = jax.block_until_ready(mlp_pallas(x, w1, b1, w2, b2))
    assert out_bf16.shape == (B, S, D)
    assert jnp.allclose(out_bf16, ref, atol=5e-2, rtol=5e-2), "bf16 path mismatch"

    # Ragged rows (N=14, not a multiple of the row tile): exercises the
    # cdiv-grid masked read/write path (no jnp.pad / slice copies).
    xr = jax.random.normal(k_x2, (2, 7, D), jnp.float32)
    ref_r = _mlp_ref(xr, w1, b1, w2, b2)
    out_r = jax.block_until_ready(
        mlp_pallas(xr, w1, b1, w2, b2, compute_dtype=jnp.float32))
    assert out_r.shape == (2, 7, D)
    assert jnp.allclose(out_r, ref_r, atol=1e-5, rtol=1e-5), "ragged path mismatch"

    # Hidden-dim streaming path (auto-selected for large D / v7x VMEM);
    # forced here at a small shape so the accumulator has 3 hidden-dim steps.
    Ds = 384
    xs = jax.random.normal(k_x2, (B, S, Ds), jnp.float32)
    w1s, b1s = _init_linear_params(k_l1b, Ds)
    w2s, b2s = _init_linear_params(k_l2b, Ds)
    ref_s = _mlp_ref(xs, w1s, b1s, w2s, b2s)
    out_s = jax.block_until_ready(
        mlp_pallas(xs, w1s, b1s, w2s, b2s,
                   compute_dtype=jnp.float32, force_stream=True))
    assert out_s.shape == (B, S, Ds)
    assert jnp.allclose(out_s, ref_s, atol=1e-4, rtol=1e-4), "stream path mismatch"

    print("KERNEL_OK")
</pallas_src>

<mosaic_0001>
module attributes {stable_mosaic.version = 11 : i64} {
  func.func @_copy(%arg0: i32, %arg1: memref<8x128xf32, #tpu.memory_space<vmem>>, %arg2: memref<8x128xf32, #tpu.memory_space<vmem>>) attributes {dimension_semantics = [#tpu.dimension_semantics<arbitrary>], iteration_bounds = array<i64: 1>, scalar_prefetch = 0 : i64, scratch_operands = 0 : i64, tpu.core_type = #tpu.core_type<tc>, window_params = [{pipeline_mode = #tpu.pipeline_mode<synchronous>, transform_indices = @transform_0, window_bounds = array<i64: 8, 128>}, {pipeline_mode = #tpu.pipeline_mode<synchronous>, transform_indices = @transform_1, window_bounds = array<i64: 8, 128>}]} {
    %c0 = arith.constant 0 : index
    %c0_0 = arith.constant 0 : index
    %0 = vector.load %arg1[%c0, %c0_0] : memref<8x128xf32, #tpu.memory_space<vmem>>, vector<8x128xf32>
    %c0_1 = arith.constant 0 : index
    %c0_2 = arith.constant 0 : index
    %1 = vector.load %arg2[%c0_1, %c0_2] : memref<8x128xf32, #tpu.memory_space<vmem>>, vector<8x128xf32>
    tpu.vector_store %arg2[%c0_1, %c0_2], %0 {strides = array<i32>} : memref<8x128xf32, #tpu.memory_space<vmem>>, vector<8x128xf32>,
    return
  }
  func.func @transform_0(%arg0: i32) -> (i32, i32) {
    %c0_i32 = arith.constant 0 : i32
    %c0_i32_0 = arith.constant 0 : i32
    %c0_i32_1 = arith.constant 0 : i32
    return %c0_i32, %c0_i32_0 : i32, i32
  }
  func.func @transform_1(%arg0: i32) -> (i32, i32) {
    %c0_i32 = arith.constant 0 : i32
    %c0_i32_0 = arith.constant 0 : i32
    %c0_i32_1 = arith.constant 0 : i32
    return %c0_i32, %c0_i32_0 : i32, i32
  }
}

module attributes {stable_mosaic.version = 11 : i64} {
  func.func @_mlp_resident_kernel(%arg0: i32, %arg1: memref<16x32xf32, #tpu.memory_space<vmem>>, %arg2: memref<32x32xf32, #tpu.memory_space<vmem>>, %arg3: memref<1x32xf32, #tpu.memory_space<vmem>>, %arg4: memref<32x32xf32, #tpu.memory_space<vmem>>, %arg5: memref<1x32xf32, #tpu.memory_space<vmem>>, %arg6: memref<16x32xf32, #tpu.memory_space<vmem>>) attributes {dimension_semantics = [#tpu.dimension_semantics<parallel>], iteration_bounds = array<i64: 1>, scalar_prefetch = 0 : i64, scratch_operands = 0 : i64, tpu.core_type = #tpu.core_type<tc>, window_params = [{transform_indices = @transform_0, window_bounds = array<i64: 16, 32>}, {pipeline_mode = #tpu.pipeline_mode<synchronous>, transform_indices = @transform_1, window_bounds = array<i64: 32, 32>}, {pipeline_mode = #tpu.pipeline_mode<synchronous>, transform_indices = @transform_2, window_bounds = array<i64: 1, 32>}, {pipeline_mode = #tpu.pipeline_mode<synchronous>, transform_indices = @transform_3, window_bounds = array<i64: 32, 32>}, {pipeline_mode = #tpu.pipeline_mode<synchronous>, transform_indices = @transform_4, window_bounds = array<i64: 1, 32>}, {transform_indices = @transform_5, window_bounds = array<i64: 16, 32>}]} {
    %c0 = arith.constant 0 : index
    %c0_0 = arith.constant 0 : index
    %0 = vector.load %arg1[%c0, %c0_0] : memref<16x32xf32, #tpu.memory_space<vmem>>, vector<16x32xf32>
    %cst = arith.constant 0.000000e+00 : f32
    %1 = vector.broadcast %cst : f32 to vector<16x32xf32>
    %c0_1 = arith.constant 0 : index
    %c0_2 = arith.constant 0 : index
    %2 = vector.load %arg2[%c0_1, %c0_2] : memref<32x32xf32, #tpu.memory_space<vmem>>, vector<32x32xf32>
    %cst_3 = arith.constant dense<0.000000e+00> : vector<16x32xf32>
    %3 = tpu.matmul %0, %2, %cst_3 {dimension_numbers = #tpu.dot_dimension_numbers<[1], [0], [0], [1], [0, 0, 1, 1], [], []>} : vector<16x32xf32>, vector<32x32xf32>, vector<16x32xf32> -> vector<16x32xf32>
    %c0_4 = arith.constant 0 : index
    %c0_5 = arith.constant 0 : index
    %4 = vector.load %arg3[%c0_4, %c0_5] : memref<1x32xf32, #tpu.memory_space<vmem>>, vector<1x32xf32>
    %5 = vector.broadcast %4 : vector<1x32xf32> to vector<16x32xf32>
    %6 = arith.addf %3, %5 : vector<16x32xf32>
    %cst_6 = arith.constant 5.000000e-01 : f32
    %7 = vector.broadcast %cst_6 : f32 to vector<16x32xf32>
    %8 = arith.mulf %7, %6 : vector<16x32xf32>
    %cst_7 = arith.constant 0.707106769 : f32
    %9 = vector.broadcast %cst_7 : f32 to vector<16x32xf32>
    %10 = arith.mulf %6, %9 : vector<16x32xf32>
    %11 = math.erf %10 : vector<16x32xf32>
    %cst_8 = arith.constant 1.000000e+00 : f32
    %12 = vector.broadcast %cst_8 : f32 to vector<16x32xf32>
    %13 = arith.addf %12, %11 : vector<16x32xf32>
    %14 = arith.mulf %8, %13 : vector<16x32xf32>
    %c0_9 = arith.constant 0 : index
    %c0_10 = arith.constant 0 : index
    %15 = vector.load %arg4[%c0_9, %c0_10] : memref<32x32xf32, #tpu.memory_space<vmem>>, vector<32x32xf32>
    %cst_11 = arith.constant dense<0.000000e+00> : vector<16x32xf32>
    %16 = tpu.matmul %14, %15, %cst_11 {dimension_numbers = #tpu.dot_dimension_numbers<[1], [0], [0], [1], [0, 0, 1, 1], [], []>} : vector<16x32xf32>, vector<32x32xf32>, vector<16x32xf32> -> vector<16x32xf32>
    %17 = arith.addf %1, %16 : vector<16x32xf32>
    %c0_12 = arith.constant 0 : index
    %c0_13 = arith.constant 0 : index
    %18 = vector.load %arg5[%c0_12, %c0_13] : memref<1x32xf32, #tpu.memory_space<vmem>>, vector<1x32xf32>
    %19 = vector.broadcast %18 : vector<1x32xf32> to vector<16x32xf32>
    %20 = arith.addf %17, %19 : vector<16x32xf32>
    %c0_14 = arith.constant 0 : index
    %c0_15 = arith.constant 0 : index
    %21 = vector.load %arg6[%c0_14, %c0_15] : memref<16x32xf32, #tpu.memory_space<vmem>>, vector<16x32xf32>
    tpu.vector_store %arg6[%c0_14, %c0_15], %20 {strides = array<i32>} : memref<16x32xf32, #tpu.memory_space<vmem>>, vector<16x32xf32>,
    return
  }
  func.func @transform_0(%arg0: i32) -> (i32, i32) {
    %c0_i32 = arith.constant 0 : i32
    %c0_i32_0 = arith.constant 0 : i32
    return %arg0, %c0_i32 : i32, i32
  }
  func.func @transform_1(%arg0: i32) -> (i32, i32) {
    %c0_i32 = arith.constant 0 : i32
    %c0_i32_0 = arith.constant 0 : i32
    %c0_i32_1 = arith.constant 0 : i32
    return %c0_i32, %c0_i32_0 : i32, i32
  }
  func.func @transform_2(%arg0: i32) -> (i32, i32) {
    %c0_i32 = arith.constant 0 : i32
    %c0_i32_0 = arith.constant 0 : i32
    %c0_i32_1 = arith.constant 0 : i32
    return %c0_i32, %c0_i32_0 : i32, i32
  }
  func.func @transform_3(%arg0: i32) -> (i32, i32) {
    %c0_i32 = arith.constant 0 : i32
    %c0_i32_0 = arith.constant 0 : i32
    %c0_i32_1 = arith.constant 0 : i32
    return %c0_i32, %c0_i32_0 : i32, i32
  }
  func.func @transform_4(%arg0: i32) -> (i32, i32) {
    %c0_i32 = arith.constant 0 : i32
    %c0_i32_0 = arith.constant 0 : i32
    %c0_i32_1 = arith.constant 0 : i32
    return %c0_i32, %c0_i32_0 : i32, i32
  }
  func.func @transform_5(%arg0: i32) -> (i32, i32) {
    %c0_i32 = arith.constant 0 : i32
    %c0_i32_0 = arith.constant 0 : i32
    return %arg0, %c0_i32 : i32, i32
  }
}

</mosaic_0001>

<bundles_post_ra>
// kernel: tpu_custom_call.1
= control target key start
LH: loop header
LB: loop body
LE: loop exit
PB: predicated region body
PF: predicated region fallthrough
CT: control target
= control target key end

     0   :  { %6 = vsyncpa [#allocation3], 0  ;;  %s102_s0 = inlined_call_operand.hbm [shape: f32[8,128], index: 0, kind: input, shape index: {}]   ;;  %s103_s1 = inlined_call_operand.hbm [shape: f32[8,128], index: 1, kind: output, shape index: {}]  }
   0x1   :  { %7 = vsyncpa [#allocation4], 0  ;;  %s84_s6 = smov [#allocation2]  }
   0x2   :  { %s14_s7 = sshll.u32 %s84_s6, 4  ;;  %s15_s7 = int_to_ptr.vmem [resolvable:$true] %s14_s7 }
   0x3   :  { %s48_s8 = scalar_lea.vmem %s15_s7, 128  ;;  %p53_p1 = scmp.lt.s32.totalorder %s15_s7, %s15_s7 }
   0x4   :  { %p49_p0 = scmp.ne.s32.totalorder %s15_s7, %s48_s8  ;;  %p54_p2 = scmp.lt.s32.totalorder %s48_s8, %s48_s8 }
   0x6   :  { %p55_p3 = por %p54_p2, %p53_p1 }
   0x8   :  { %p56_p4 = pnand %p55_p3, %p49_p0 }
   0xa   :  { %59 = shalt.err (!%p56_p4)
}
   0xb   :  { %17 = dma.hbm_to_vmem [thread:$0]  %s102_s0, 128, %s15_s7, [#allocation3]  }
   0xc   :  { %80 = dma.done.wait [#allocation3], 128  }
   0xd   :  { %81 = vsyncadd [#allocation3], 4294967168  ;;  %s85_s11 = smov [#allocation5]   ;;  %v21_v0 = vld [vmem:[#allocation2] sm:$0xff] }
   0xe   :  { %s29_s12 = sshll.u32 %s85_s11, 4  ;;  %22 = vst [vmem:[#allocation5] sm:$0xff] %v21_v0  ;;  %s30_s12 = int_to_ptr.vmem [resolvable:$true] %s29_s12 }
   0xf   :  { %s60_s13 = scalar_lea.vmem %s30_s12, 128  ;;  %p65_p6 = scmp.lt.s32.totalorder %s30_s12, %s30_s12 }
  0x10   :  { %p61_p5 = scmp.ne.s32.totalorder %s30_s12, %s60_s13  ;;  %p66_p7 = scmp.lt.s32.totalorder %s60_s13, %s60_s13 }
  0x12   :  { %p67_p8 = por %p66_p7, %p65_p6 }
  0x14   :  { %p68_p9 = pnand %p67_p8, %p61_p5 }
  0x16   :  { %71 = shalt.err (!%p68_p9)
}
  0x17   :  { %32 = dma.vmem_to_hbm [thread:$0]  %s30_s12, 128, %s103_s1, [#allocation4]  }
  0x18   :  { %82 = dma.done.wait [#allocation4], 128  }
  0x19   :  { %83 = vsyncadd [#allocation4], 4294967168 }
  0x1a   :  { %36 = vsyncpa [#allocation3], 1 }
  0x1b   :  { %37 = vsyncpa [#allocation4], 1 }

// kernel: _mlp_impl.1
= control target key start
LH: loop header
LB: loop body
LE: loop exit
PB: predicated region body
PF: predicated region fallthrough
CT: control target
= control target key end

     0   :  { %vm34_vm0 = vcmask 261120   ;;  %s383_s0 = inlined_call_operand.vmem [shape: f32[16,32], index: 0, kind: input, shape index: {}]   ;;  %s384_s1 = inlined_call_operand.vmem [shape: f32[32,32], index: 1, kind: input, shape index: {}]   ;;  %s385_s2 = inlined_call_operand.vmem [shape: f32[1,32], index: 2, kind: input, shape index: {}]   ;;  %s386_s3 = inlined_call_operand.vmem [shape: f32[32,32], index: 3, kind: input, shape index: {}]   ;;  %s387_s4 = inlined_call_operand.vmem [shape: f32[1,32], index: 4, kind: input, shape index: {}]   ;;  %s388_s5 = inlined_call_operand.hbm [shape: f32[16,32], index: 5, kind: output, shape index: {}]  }
   0x1   :  { %v26_v0 = vld [vmem:[%s384_s1 + $0x18] sm:$0xff]  ;;  %v25_v1 = vld [vmem:[%s384_s1 + $0x10] sm:$0xff]  ;;  %v21_v2 = vld [vmem:[%s383_s0] sm:$0xff] }
   0x2   :  { %254 = vmatprep.subr.mxu0 %v26_v0  ;;  %v24_v3 = vld [vmem:[%s384_s1 + $0x8] sm:$0xff]  ;;  %262 = vmatprep.mubr.msk.f32.mxu0 %vm34_vm0, %v21_v2 }
   0x3   :  { %255 = vmatpush3.msra.mxu0 %v26_v0 }
   0x4   :  { %10 = vsyncpa [#allocation3], 0  ;;  %256 = vmatprep.subr.mxu0 %v25_v1  ;;  %v23_v4 = vld [vmem:[%s384_s1] sm:$0xff]  ;;  %v22_v5 = vld [vmem:[%s383_s0 + $0x8] sm:$0xff]  ;;  %s305_s13 = smov [#allocation2]  }
   0x5   :  { %257 = vmatpush3.msra.mxu0 %v25_v1  ;;  %v129_v6 = vld [vmem:[%s386_s3 + $0x18] sm:$0xff]  ;;  %v128_v7 = vld [vmem:[%s386_s3 + $0x10] sm:$0xff]  ;;  %v127_v8 = vld [vmem:[%s386_s3 + $0x8] sm:$0xff]  ;;  %s225_s14 = sshll.u32 %s305_s13, 4  ;;  %s226_s14 = int_to_ptr.vmem [resolvable:$true] %s225_s14 }
   0x6   :  { %258 = vmatprep.subr.mxu0 %v24_v3  ;;  %265 = vmatprep.subr.mxu1 %v129_v6  ;;  %v126_v9 = vld [vmem:[%s386_s3] sm:$0xff]  ;;  %s283_s15 = scalar_lea.vmem %s226_s14, 256  ;;  %p288_p1 = scmp.lt.s32.totalorder %s226_s14, %s226_s14 }
   0x7   :  { %259 = vmatpush3.msra.mxu0 %v24_v3  ;;  %266 = vmatpush3.msra.mxu1 %v129_v6  ;;  %v236_v10 = vld [vmem:[%s385_s2] ss:$0 sm:$0xff]  ;;  %p284_p0 = scmp.ne.s32.totalorder %s226_s14, %s283_s15  ;;  %p289_p2 = scmp.lt.s32.totalorder %s283_s15, %s283_s15 }
   0x8   :  { %260 = vmatprep.subr.mxu0 %v23_v4  ;;  %267 = vmatprep.subr.mxu1 %v128_v7  ;;  %v239_v25 = vld [vmem:[%s387_s4] ss:$0 sm:$0xff] }
   0x9   :  { %261 = vmatpush3.msra.mxu0 %v23_v4  ;;  %268 = vmatpush3.msra.mxu1 %v128_v7  ;;  %p290_p3 = por %p289_p2, %p288_p1 }
   0xa   :  { %263 = vmatmul.mubr.msk.f32.vlgmr.msra.gmra.mxu0 %vm34_vm0, %v22_v5  ;;  %269 = vmatprep.subr.mxu1 %v127_v8 }
   0xb   :  { %270 = vmatpush3.msra.mxu1 %v127_v8  ;;  %p291_p4 = pnand %p290_p3, %p284_p0 }
   0xc   :  { %271 = vmatprep.subr.mxu1 %v126_v9 }
   0xd   :  { %272 = vmatpush3.msra.mxu1 %v126_v9 }
  0xca   :  { %v264_v11 = vpop.f32.mrf.mxu0 }
  0xcb   :  { %v113_v12 = vadd.f32 %v264_v11, %v236_v10 }
  0xcc   :  { %v107_v13 = vpop.f32.mrf.mxu0 }
  0xcd   :  { %v119_v14 = vmul.f32 0.70710677, %v113_v12  ;;  %v108_v15 = vadd.f32 %v236_v10, %v107_v13  ;;  %v117_v22 = vmul.f32 0.5, %v113_v12 }
  0xcf   :  { %279 = verf.f32 %v119_v14  ;;  %v118_v16 = vmul.f32 0.70710677, %v108_v15  ;;  %v116_v20 = vmul.f32 0.5, %v108_v15 }
  0xd1   :  { %281 = verf.f32 %v118_v16 }
  0xdc   :  { %v280_v17 = vpop.eup %279 }
  0xdd   :  { %v123_v19 = vadd.f32 1.0, %v280_v17 }
  0xde   :  { %v282_v18 = vpop.eup %281 }
  0xdf   :  { %v122_v21 = vadd.f32 1.0, %v282_v18  ;;  %v125_v24 = vmul.f32 %v123_v19, %v117_v22 }
  0xe1   :  { %v124_v23 = vmul.f32 %v122_v21, %v116_v20 }
  0xe3   :  { %273 = vmatprep.mubr.msk.f32.mxu1 %vm34_vm0, %v124_v23 }
  0xe4   :  { %274 = vmatmul.mubr.msk.f32.vlgmr.msra.gmra.mxu1 %vm34_vm0, %v125_v24 }
 0x1a4   :  { %v275_v26 = vpop.f32.mrf.mxu1 }
 0x1a5   :  { %v215_v27 = vadd.f32 %v275_v26, %v239_v25 }
 0x1a6   :  { %v209_v28 = vpop.f32.mrf.mxu1 }
 0x1a7   :  { %219 = vst.msk [vmem:[#allocation2 + $0x8] sm:$0xff] %vm34_vm0, %v215_v27  ;;  %v210_v29 = vadd.f32 %v239_v25, %v209_v28 }
 0x1a9   :  { %218 = vst.msk [vmem:[#allocation2] sm:$0xff] %vm34_vm0, %v210_v29 }
 0x1aa   :  { %294 = shalt.err (!%p291_p4)
}
 0x1ab   :  { %s306_s16 = smov 128   ;;  %s307_s4 = smov 8  }
 0x1ac   :  { %231 = dma.vmem_to_hbm [thread:$0]  %s226_s14, 256, %s388_s5, [#allocation3], %s306_s16, %s306_s16, %s307_s4  }
 0x1ad   :  { %303 = dma.done.wait [#allocation3], 256  }
 0x1ae   :  { %304 = vsyncadd [#allocation3], 4294967040 }
 0x1af   :  { %235 = vsyncpa [#allocation3], 1 }

</bundles_post_ra>
